<compile_context>
chip_gen: v6e
topology: v6e:2x2x1
jax: 0.10.0
libtpu: 0.0.40
codegen_flags: <defaults>
</compile_context>

<pallas_src>
import jax
import jax.numpy as jnp
from jax import lax
from jax.experimental import pallas as pl
from jax.experimental.pallas import tpu as pltpu


def fusion_head_kernel(text_ref, img_ref, wt_ref, wi_ref, b_ref, out_ref):
    # text_ref: (TB, 1, 768) bf16   (CLS rows only)
    # img_ref : (TB, 49, 2048) bf16
    # wt_ref  : (NL, 768) bf16 ; wi_ref: (NL, 2048) bf16 ; b_ref: (1, NL) f32
    # out_ref : (TB, 1, NL) f32
    text_feat = text_ref[:, 0, :]                    # (TB, 768)
    img_feat = jnp.max(img_ref[...], axis=1)         # (TB, 2048) max over 49 rows

    # concat(text, img) @ W.T  ==  split matmul sum; contract feature axes
    # against the un-transposed weight slices (axis 1 of each weight).
    dn = (((1,), (1,)), ((), ()))
    logits = (
        lax.dot_general(text_feat, wt_ref[...], dn,
                        preferred_element_type=jnp.float32)
        + lax.dot_general(img_feat, wi_ref[...], dn,
                          preferred_element_type=jnp.float32)
        + b_ref[...]
    )                                                # (TB, NL) f32
    # NOTE: NL=3 -> lane-padded weights and a masked output store; negligible
    # here (DMA-bound). If NL grows, pick it as a multiple of 128.
    out_ref[:, 0, :] = logits.astype(out_ref.dtype)


def concat_forward(text_hidden, img_hidden_nchw, w_classifier, b_classifier,
                   *, tb=8):
    """Concat.forward(text, image), both-present branch, from encoder outputs."""
    B, S, H_text = text_hidden.shape
    NL = w_classifier.shape[0]
    H_img = 2048

    # CLS slice in the wrapper: never DMA the full (B, S, 768) tensor.
    text_cls = text_hidden[:, 0, :].reshape(B, 1, H_text).astype(jnp.bfloat16)

    # Exact torch `.view(-1, 49, 2048)` semantics (raw reinterpretation of the
    # NCHW tensor).  TODO(synk): this reproduces the original module's
    # channel/spatial-interleaved max — confirm it is intended upstream.
    img_seq = img_hidden_nchw.reshape(-1, 49, H_img).astype(jnp.bfloat16)

    # Un-transposed weight slices (no per-call transpose ops).
    wt = w_classifier[:, :H_text].astype(jnp.bfloat16)   # (NL, 768)
    wi = w_classifier[:, H_text:].astype(jnp.bfloat16)   # (NL, 2048)
    bb = b_classifier.reshape(1, NL).astype(jnp.float32)  # (1, NL)

    # Batch tile: TB*49*2048*2B ~ TB*200 KB image tile, double-buffered —
    # comfortably under the v7x 64 MiB / default scoped-VMEM limits for TB<=32.
    tb = max(1, min(tb, B))
    grid = (pl.cdiv(B, tb),)

    cost = pl.CostEstimate(
        flops=2 * B * (H_text + H_img) * NL,
        transcendentals=0,
        bytes_accessed=(text_cls.size * 2 + img_seq.size * 2
                        + wt.size * 2 + wi.size * 2
                        + bb.size * 4 + B * NL * 4),
    )

    grid_spec = pltpu.PrefetchScalarGridSpec(
        num_scalar_prefetch=0,
        grid=grid,
        in_specs=[
            pl.BlockSpec((tb, 1, H_text), lambda i: (i, 0, 0)),   # CLS rows
            pl.BlockSpec((tb, 49, H_img), lambda i: (i, 0, 0)),   # image tile
            pl.BlockSpec((NL, H_text), lambda i: (0, 0)),         # resident
            pl.BlockSpec((NL, H_img), lambda i: (0, 0)),          # resident
            pl.BlockSpec((1, NL), lambda i: (0, 0)),              # resident
        ],
        out_specs=pl.BlockSpec((tb, 1, NL), lambda i: (i, 0, 0)),
    )

    out = pl.pallas_call(
        fusion_head_kernel,
        out_shape=jax.ShapeDtypeStruct((B, 1, NL), jnp.float32),
        grid_spec=grid_spec,
        compiler_params=pltpu.CompilerParams(
            dimension_semantics=("parallel",),   # batch steps are independent
        ),
        cost_estimate=cost,
    )(text_cls, img_seq, wt, wi, bb)
    return out.reshape(B, NL)


if __name__ == "__main__":
    key = jax.random.PRNGKey(0)
    k_text, k_img, k_w, k_b = jax.random.split(key, 4)

    B, S = 2, 8
    H_TEXT, H_IMG, NUM_LABELS = 768, 2048, 3

    # Synthetic encoder outputs (stand-ins for BERT / ResNet-50 forward passes).
    text_hidden = jax.random.normal(k_text, (B, S, H_TEXT), dtype=jnp.float32)
    img_hidden = jax.random.normal(k_img, (B, H_IMG, 7, 7), dtype=jnp.float32)

    # Deterministic classifier params: nn.Linear(768 + 2048, 3)
    fan_in = H_TEXT + H_IMG
    bound = 1.0 / (fan_in ** 0.5)
    w_classifier = jax.random.uniform(
        k_w, (NUM_LABELS, fan_in), minval=-bound, maxval=bound, dtype=jnp.float32
    )
    b_classifier = jax.random.uniform(
        k_b, (NUM_LABELS,), minval=-bound, maxval=bound, dtype=jnp.float32
    )

    # tb=1 here so the B=2 demo exercises a multi-step (grid=(2,)) batch tiling.
    logits = concat_forward(text_hidden, img_hidden, w_classifier, b_classifier,
                            tb=1)
    logits = jax.block_until_ready(logits)
    assert logits.shape == (B, NUM_LABELS)

    # Reference 1: same bf16 feature/weight precision as the kernel path.
    text_cls_bf = text_hidden[:, 0, :].astype(jnp.bfloat16)
    img_feat_bf = img_hidden.reshape(-1, 49, H_IMG).astype(jnp.bfloat16).max(axis=1)
    wt_bf = w_classifier[:, :H_TEXT].astype(jnp.bfloat16)
    wi_bf = w_classifier[:, H_TEXT:].astype(jnp.bfloat16)
    ref_bf = (
        jnp.dot(text_cls_bf, wt_bf.T, preferred_element_type=jnp.float32)
        + jnp.dot(img_feat_bf, wi_bf.T, preferred_element_type=jnp.float32)
        + b_classifier
    )
    assert jnp.allclose(logits, ref_bf, atol=1e-3, rtol=1e-3)

    # Reference 2: full-f32 torch-semantics head (looser tol due to bf16 inputs).
    feats_f32 = jnp.concatenate(
        [text_hidden[:, 0, :], img_hidden.reshape(-1, 49, H_IMG).max(axis=1)],
        axis=1,
    )
    ref_f32 = feats_f32 @ w_classifier.T + b_classifier
    assert jnp.allclose(logits, ref_f32, atol=5e-2, rtol=5e-2)

    print("KERNEL_OK")
</pallas_src>

<mosaic_0001>
module attributes {stable_mosaic.version = 11 : i64} {
  func.func @fusion_head_kernel(%arg0: i32, %arg1: memref<1x1x768xbf16, #tpu.memory_space<vmem>>, %arg2: memref<1x49x2048xbf16, #tpu.memory_space<vmem>>, %arg3: memref<3x768xbf16, #tpu.memory_space<vmem>>, %arg4: memref<3x2048xbf16, #tpu.memory_space<vmem>>, %arg5: memref<1x3xf32, #tpu.memory_space<vmem>>, %arg6: memref<1x1x3xf32, #tpu.memory_space<vmem>>) attributes {dimension_semantics = [#tpu.dimension_semantics<parallel>], iteration_bounds = array<i64: 2>, scalar_prefetch = 0 : i64, scratch_operands = 0 : i64, tpu.core_type = #tpu.core_type<tc>, window_params = [{transform_indices = @transform_0, window_bounds = array<i64: 1, 1, 768>}, {transform_indices = @transform_1, window_bounds = array<i64: 1, 49, 2048>}, {pipeline_mode = #tpu.pipeline_mode<synchronous>, transform_indices = @transform_2, window_bounds = array<i64: 3, 768>}, {pipeline_mode = #tpu.pipeline_mode<synchronous>, transform_indices = @transform_3, window_bounds = array<i64: 3, 2048>}, {pipeline_mode = #tpu.pipeline_mode<synchronous>, transform_indices = @transform_4, window_bounds = array<i64: 1, 3>}, {transform_indices = @transform_5, window_bounds = array<i64: 1, 1, 3>}]} {
    %c0 = arith.constant 0 : index
    %c0_0 = arith.constant 0 : index
    %c0_1 = arith.constant 0 : index
    %0 = vector.load %arg1[%c0, %c0_0, %c0_1] : memref<1x1x768xbf16, #tpu.memory_space<vmem>>, vector<1x1x768xbf16>
    %1 = vector.shape_cast %0 : vector<1x1x768xbf16> to vector<1x768xbf16>
    %c0_2 = arith.constant 0 : index
    %c0_3 = arith.constant 0 : index
    %c0_4 = arith.constant 0 : index
    %2 = vector.load %arg2[%c0_2, %c0_3, %c0_4] : memref<1x49x2048xbf16, #tpu.memory_space<vmem>>, vector<1x49x2048xbf16>
    %cst = arith.constant dense<0xFF80> : vector<1x2048xbf16>
    %3 = vector.multi_reduction <maximumf>, %2, %cst [1] : vector<1x49x2048xbf16> to vector<1x2048xbf16>
    %c0_5 = arith.constant 0 : index
    %c0_6 = arith.constant 0 : index
    %4 = vector.load %arg3[%c0_5, %c0_6] : memref<3x768xbf16, #tpu.memory_space<vmem>>, vector<3x768xbf16>
    %cst_7 = arith.constant dense<0.000000e+00> : vector<1x3xf32>
    %5 = tpu.matmul %1, %4, %cst_7 {dimension_numbers = #tpu.dot_dimension_numbers<[1], [1], [0], [0], [0, 0, 1, 0], [], []>} : vector<1x768xbf16>, vector<3x768xbf16>, vector<1x3xf32> -> vector<1x3xf32>
    %c0_8 = arith.constant 0 : index
    %c0_9 = arith.constant 0 : index
    %6 = vector.load %arg4[%c0_8, %c0_9] : memref<3x2048xbf16, #tpu.memory_space<vmem>>, vector<3x2048xbf16>
    %cst_10 = arith.constant dense<0.000000e+00> : vector<1x3xf32>
    %7 = tpu.matmul %3, %6, %cst_10 {dimension_numbers = #tpu.dot_dimension_numbers<[1], [1], [0], [0], [0, 0, 1, 0], [], []>} : vector<1x2048xbf16>, vector<3x2048xbf16>, vector<1x3xf32> -> vector<1x3xf32>
    %8 = arith.addf %5, %7 : vector<1x3xf32>
    %c0_11 = arith.constant 0 : index
    %c0_12 = arith.constant 0 : index
    %9 = vector.load %arg5[%c0_11, %c0_12] : memref<1x3xf32, #tpu.memory_space<vmem>>, vector<1x3xf32>
    %10 = arith.addf %8, %9 : vector<1x3xf32>
    %c0_13 = arith.constant 0 : index
    %c0_14 = arith.constant 0 : index
    %c0_15 = arith.constant 0 : index
    %11 = vector.load %arg6[%c0_13, %c0_14, %c0_15] : memref<1x1x3xf32, #tpu.memory_space<vmem>>, vector<1x1x3xf32>
    %12 = vector.shape_cast %11 : vector<1x1x3xf32> to vector<1x3xf32>
    %13 = vector.shape_cast %10 : vector<1x3xf32> to vector<1x1x3xf32>
    tpu.vector_store %arg6[%c0_13, %c0_14, %c0_15], %13 {strides = array<i32>} : memref<1x1x3xf32, #tpu.memory_space<vmem>>, vector<1x1x3xf32>,
    return
  }
  func.func @transform_0(%arg0: i32) -> (i32, i32, i32) {
    %c0_i32 = arith.constant 0 : i32
    %c0_i32_0 = arith.constant 0 : i32
    %c0_i32_1 = arith.constant 0 : i32
    return %arg0, %c0_i32, %c0_i32_0 : i32, i32, i32
  }
  func.func @transform_1(%arg0: i32) -> (i32, i32, i32) {
    %c0_i32 = arith.constant 0 : i32
    %c0_i32_0 = arith.constant 0 : i32
    %c0_i32_1 = arith.constant 0 : i32
    return %arg0, %c0_i32, %c0_i32_0 : i32, i32, i32
  }
  func.func @transform_2(%arg0: i32) -> (i32, i32) {
    %c0_i32 = arith.constant 0 : i32
    %c0_i32_0 = arith.constant 0 : i32
    %c0_i32_1 = arith.constant 0 : i32
    return %c0_i32, %c0_i32_0 : i32, i32
  }
  func.func @transform_3(%arg0: i32) -> (i32, i32) {
    %c0_i32 = arith.constant 0 : i32
    %c0_i32_0 = arith.constant 0 : i32
    %c0_i32_1 = arith.constant 0 : i32
    return %c0_i32, %c0_i32_0 : i32, i32
  }
  func.func @transform_4(%arg0: i32) -> (i32, i32) {
    %c0_i32 = arith.constant 0 : i32
    %c0_i32_0 = arith.constant 0 : i32
    %c0_i32_1 = arith.constant 0 : i32
    return %c0_i32, %c0_i32_0 : i32, i32
  }
  func.func @transform_5(%arg0: i32) -> (i32, i32, i32) {
    %c0_i32 = arith.constant 0 : i32
    %c0_i32_0 = arith.constant 0 : i32
    %c0_i32_1 = arith.constant 0 : i32
    return %arg0, %c0_i32, %c0_i32_0 : i32, i32, i32
  }
}

</mosaic_0001>

<bundles_post_ra>
// kernel: tpu_custom_call.1
= control target key start
LH: loop header
LB: loop body
LE: loop exit
PB: predicated region body
PF: predicated region fallthrough
CT: control target
= control target key end

     0   :  { %10 = vsyncpa [#allocation3], 0  ;;  %s2170_s0 = inlined_call_operand.vmem [shape: bf16[2,1,768], index: 0, kind: input, shape index: {}]   ;;  %s2171_s1 = inlined_call_operand.vmem [shape: bf16[2,49,2048], index: 1, kind: input, shape index: {}]   ;;  %s2172_s2 = inlined_call_operand.vmem [shape: bf16[3,768], index: 2, kind: input, shape index: {}]   ;;  %s2173_s3 = inlined_call_operand.vmem [shape: bf16[3,2048], index: 3, kind: input, shape index: {}]   ;;  %s2174_s4 = inlined_call_operand.vmem [shape: f32[1,3], index: 4, kind: input, shape index: {}]   ;;  %s2175_s5 = inlined_call_operand.hbm [shape: f32[2,1,3], index: 5, kind: output, shape index: {}]  }
   0x1   :  { %12 = vsyncpa [#allocation3 + $0x1], 0  ;;  %s1759_s18 = smov 0   ;;  %s1761_s19 = smov 0  }
   0x2   :  { %s1763_s20 = smov 0   ;;  %s1765_s21 = smov 0  }
   0x3 LB: > { %s1780_s22 = sadd.s32 4294967295, %s1724_s21   ;;  %s1526_s23 = sadd.s32 4294967294, %s1724_s21   ;;  %s1724_s21 = sphi %s1765_s21, %s2183_s21   ;;  %s1720_s20 = sphi %s1763_s20, %s2182_s20   ;;  %s1716_s19 = sphi %s1761_s19, %s2181_s19   ;;  %s1712_s18 = sphi %s1759_s18, %s2180_s18  }
   0x4   : > { %s1784_s24 = sadd.s32 1, %s1724_s21   ;;  %s140_s25 = sadd.s32 1, %s1720_s20 }
   0x5   : > { %s137_s26 = ssub.s32 %s1724_s21, %s1784_s24  ;;  %p150_p0 = scmp.ne.s32.totalorder %s1720_s20, %s1716_s19 }
   0x6   : > { %p138_p1 = scmp.eq.s32.totalorder %s137_s26, 0  ;;  %p151_p2 = scmp.eq.s32.totalorder %s1780_s22, 1 }
   0x7   : > { %p156_p3 = scmp.ne.s32.totalorder %s1716_s19, %s1712_s18  ;;  %p157_p4 = scmp.eq.s32.totalorder %s1526_s23, 1 }
   0x8   : > { %s1795_s27 = scalar_select %p138_p1, %s1720_s20, %s140_s25  }
   0x9   : > { %p1797_p5 = por %p151_p2, %p150_p0  ;;  %p1801_p6 = por %p157_p4, %p156_p3 }
   0xa   : > { %p1529_p7 = scmp.ge.s32.totalorder %s1724_s21, 1  ;;  %p199_p8 = scmp.lt.s32.totalorder %s1724_s21, 3 }
   0xc   : > { %p200_p9 = pnand %p1529_p7, %p199_p8 }
   0xd   : > { %p230_p10 = scmp.lt.s32.totalorder (!%p200_p9), %s1780_s22, 1  ;;  %s228_s10 = sand.u32 (!%p200_p9), 1, %s1716_s19  }
   0xe   : > { %203 = sbr.rel (%p200_p9) target bundleno = 340 (0x154), region = 40  ;;  %s1596_s13 = sshll.u32 (!%p200_p9), %s1780_s22, 4 }
   0xf   : > { %s229_s14 = scalar_lea.vmem (!%p200_p9), [#allocation2], %s228_s10  ;;  %s2129_s23 = scalar_lea.hbm (!%p200_p9), %s2175_s5, %s1596_s13 }
  0x10   : > { %s1459_s15 = sshll.u32 (!%p200_p9), %s229_s14, 4  ;;  %s2131_s15 = int_to_ptr.vmem [resolvable:$true] %s1459_s15 }
  0x13   : > { %v823_v0 = vld [vmem:[%s2173_s3] sm:$0xff]  ;;  %v835_v1 = vlaneseq  ;;  %v824_v2 = vld [vmem:[%s2173_s3 + $0x8] sm:$0xff]  ;;  %v1726_v3 = vmov 1983009808   ;;  %v825_v5 = vld [vmem:[%s2173_s3 + $0x10] sm:$0xff]  ;;  %s1820_s11 = scalar_select %p230_p10, %s1780_s22, 1 }
  0x14   : > { %v833_v4 = vunpack.c.l.s4 %v1726_v3  ;;  %v831_v7 = vcombine.high %v823_v0, %v823_v0  ;;  %vm596_vm0 = vcmask 1040384   ;;  %vm597_vm1 = vsmask.f32 256  ;;  %v1825_v10 = vld [vmem:[%s2173_s3 + $0x18] sm:$0xff]  ;;  %v1830_v11 = vld [vmem:[%s2172_s2] sm:$0xff]  ;;  %s1447_s22 = scalar_lea.sflag [#allocation3], %s228_s10 }
  0x15   : > { %v1817_v6 = vshrl.u32 %v835_v1, 7  ;;  %v848_v9 = vcombine.high %v824_v2, %v824_v2  ;;  %s1600_s16 = smul.u32 448, %s1820_s11  ;;  %v865_v12 = vcombine.high %v825_v5, %v825_v5  ;;  %vm1841_vm2 = vmand %vm596_vm0, %vm597_vm1  ;;  %v882_v15 = vcombine.high %v1825_v10, %v1825_v10 }
  0x16   : > { %v834_v8 = vunpack.c.0.s8 %v833_v4  ;;  %v1291_v16 = vcombine.high %v1830_v11, %v1830_v11  ;;  %v1727_v17 = vmov 1966171168   ;;  %s1599_s26 = smul.u32 6, %s1820_s11  ;;  %vm1444_vm3 = vcmask 16384  }
  0x17   : > { %s1839_s25 = scalar_lea.vmem %s2171_s1, %s1600_s16  ;;  %v1849_v18 = vunpack.c.l.s4 %v1727_v17 }
  0x18   : > { %v1834_v13 = vsub.s32 %v834_v8, %v1817_v6  ;;  %v242_v21 = vld [vmem:[%s1839_s25] sm:$0xff]  ;;  %v243_v38 = vld [vmem:[%s1839_s25 + $0x8] sm:$0xff]  ;;  %v1883_v61 = vld [vmem:[%s1839_s25 + $0x10] sm:$0xff]  ;;  %s233_s7 = scalar_lea.vmem %s2170_s0, %s1599_s26  ;;  %s1728_s26 = smov [#allocation2]  }
  0x19   : > { %v250_v22 = vld [vmem:[%s1839_s25 + $0x40] sm:$0xff]  ;;  %v251_v39 = vld [vmem:[%s1839_s25 + $0x48] sm:$0xff]  ;;  %v1239_v52 = vunpack.c.0.s8 %v1849_v18  ;;  %v1886_v62 = vld [vmem:[%s1839_s25 + $0x50] sm:$0xff]  ;;  %s1668_s30 = sshll.u32 %s1728_s26, 4  ;;  %s1669_s30 = int_to_ptr.vmem [resolvable:$false] %s1668_s30 }
  0x1a   : > { %v838_v19 = vrot.slane %v823_v0, %v1834_v13  ;;  %v845_v20 = vrot.slane %v831_v7, %v1834_v13  ;;  %v258_v23 = vld [vmem:[%s1839_s25 + $0x80] sm:$0xff]  ;;  %v1857_v24 = vrot.slane %v824_v2, %v1834_v13  ;;  %v1860_v25 = vrot.slane %v848_v9, %v1834_v13  ;;  %v259_v44 = vld [vmem:[%s1839_s25 + $0x88] sm:$0xff]  ;;  %v1897_v8 = vld [vmem:[%s1839_s25 + $0x90] sm:$0xff]  ;;  %s1670_s6 = scalar_lea.vmem %s1669_s30, 32  ;;  %p1671_p0 = scmp.lt.s32.totalorder %s2131_s15, %s1669_s30 }
  0x1b   : > { %v266_v26 = vld [vmem:[%s1839_s25 + $0xc0] sm:$0xff]  ;;  %v1531_v29 = vcombine.low %v242_v21, %v250_v22  ;;  %v1532_v30 = vcombine.high %v242_v21, %v250_v22  ;;  %v1866_v31 = vrot.slane %v825_v5, %v1834_v13  ;;  %v1869_v32 = vrot.slane %v865_v12, %v1834_v13  ;;  %v267_v45 = vld [vmem:[%s1839_s25 + $0xc8] sm:$0xff]  ;;  %v1900_v9 = vld [vmem:[%s1839_s25 + $0xd0] sm:$0xff] }
  0x1c   : > { %v274_v27 = vld [vmem:[%s1839_s25 + $0x100] sm:$0xff]  ;;  %v846_v33 = vcombine.high %v838_v19, %v838_v19  ;;  %v847_v34 = vcombine.high %v845_v20, %v845_v20  ;;  %v1547_v36 = vcombine.low %v258_v23, %v266_v26  ;;  %v1548_v37 = vcombine.high %v258_v23, %v266_v26  ;;  %v275_v46 = vld [vmem:[%s1839_s25 + $0x108] sm:$0xff]  ;;  %v1908_v21 = vld [vmem:[%s1839_s25 + $0x150] sm:$0xff] }
  0x1d   : > { %v282_v28 = vld [vmem:[%s1839_s25 + $0x140] sm:$0xff]  ;;  %v283_v48 = vld [vmem:[%s1839_s25 + $0x148] sm:$0xff]  ;;  %v1533_v50 = vcombine.low %v243_v38, %v251_v39  ;;  %v1534_v51 = vcombine.high %v243_v38, %v251_v39  ;;  %v1549_v54 = vcombine.low %v259_v44, %v267_v45  ;;  %v1550_v55 = vcombine.high %v259_v44, %v267_v45  ;;  %v1926_v44 = vld [vmem:[%s1839_s25 + $0x18] sm:$0xff] }
  0x1e   : > { %v290_v35 = vld [vmem:[%s1839_s25 + $0x180] sm:$0x11]  ;;  %v1563_v40 = vcombine.low %v274_v27, %v282_v28  ;;  %v1564_v41 = vcombine.high %v274_v27, %v282_v28  ;;  %929 = vmatprep.subr.bf16.mxu0 %v846_v33  ;;  %969 = vmatprep.subr.bf16.mxu1 %v847_v34  ;;  %v611_v47 = vmax.bf16 %v1548_v37, %v1532_v30  ;;  %v291_v49 = vld [vmem:[%s1839_s25 + $0x188] sm:$0x11]  ;;  %v1915_v33 = vld [vmem:[%s1839_s25 + $0x190] sm:$0x11] }
  0x1f   : > { %v1579_v42 = vcombine.low %v290_v35, %v290_v35  ;;  %v1580_v43 = vcombine.high %v290_v35, %v290_v35  ;;  %930 = vmatpush1.bf16.xpose.msra.mxu0 %v838_v19  ;;  %970 = vmatpush1.bf16.xpose.msra.mxu1 %v845_v20  ;;  %v1565_v56 = vcombine.low %v275_v46, %v283_v48  ;;  %v1905_v20 = vld [vmem:[%s1839_s25 + $0x110] sm:$0xff]  ;;  %v1929_v45 = vld [vmem:[%s1839_s25 + $0x58] sm:$0xff] }
  0x20   : > { %v612_v57 = vmax.bf16 %v1564_v41, %v611_v47  ;;  %v1566_v58 = vcombine.high %v275_v46, %v283_v48  ;;  %v1581_v59 = vcombine.low %v291_v49, %v291_v49  ;;  %v1582_v60 = vcombine.high %v291_v49, %v291_v49 }
  0x21   : > { %v613_v53 = vsel %vm1841_vm2, %v1580_v43, 4286644096  ;;  %v639_v63 = vmax.bf16 %v1550_v55, %v1534_v51  ;;  %v863_v0 = vcombine.high %v1857_v24, %v1857_v24  ;;  %v594_v1 = vmax.bf16 %v1547_v36, %v1531_v29  ;;  %v261_v55 = vld [vmem:[%s1839_s25 + $0x98] sm:$0xff] }
  0x22   : > { %v599_v2 = vsel %vm1841_vm2, %v1579_v42, 4286644096  ;;  %v614_v3 = vmax.bf16 %v613_v53, %v612_v57  ;;  %v641_v4 = vsel %vm1841_vm2, %v1582_v60, 4286644096  ;;  %v625_v5 = vmax.bf16 %v1549_v54, %v1533_v50  ;;  %v285_v60 = vld [vmem:[%s1839_s25 + $0x158] sm:$0xff] }
  0x23   : > { %v627_v7 = vsel %vm1841_vm2, %v1581_v59, 4286644096  ;;  %v640_v12 = vmax.bf16 %v1566_v58, %v639_v63  ;;  %1009 = vmatprep.subr.bf16.mxu0 %v863_v0  ;;  %v595_v17 = vmax.bf16 %v1563_v40, %v594_v1  ;;  %v864_v19 = vcombine.high %v1860_v25, %v1860_v25  ;;  %v1938_v59 = vld [vmem:[%s1839_s25 + $0x118] sm:$0xff] }
  0x24   : > { %v1535_v22 = vcombine.low %v1883_v61, %v1886_v62  ;;  %v615_v23 = vunpack.i.l.bf16 %v614_v3  ;;  %v616_v26 = vunpack.i.h.bf16 %v614_v3  ;;  %v626_v27 = vmax.bf16 %v1565_v56, %v625_v5  ;;  %v269_v56 = vld [vmem:[%s1839_s25 + $0xd8] sm:$0xff] }
  0x25   : > { %v1536_v28 = vcombine.high %v1883_v61, %v1886_v62  ;;  %v642_v29 = vmax.bf16 %v641_v4, %v640_v12  ;;  %v600_v30 = vmax.bf16 %v599_v2, %v595_v17  ;;  %1049 = vmatprep.subr.bf16.mxu1 %v864_v19  ;;  %v1551_v34 = vcombine.low %v1897_v8, %v1900_v9  ;;  %v293_v5 = vld [vmem:[%s1839_s25 + $0x198] sm:$0x11] }
  0x26   : > { %v1552_v35 = vcombine.high %v1897_v8, %v1900_v9  ;;  %v617_v36 = vmax.f32 %v615_v23, %v616_v26  ;;  %v628_v37 = vmax.bf16 %v627_v7, %v626_v27  ;;  %v1567_v38 = vcombine.low %v1905_v20, %v1908_v21 }
  0x27   : > { %v1568_v39 = vcombine.high %v1905_v20, %v1908_v21  ;;  %v643_v40 = vunpack.i.l.bf16 %v642_v29  ;;  %v644_v41 = vunpack.i.h.bf16 %v642_v29  ;;  %v601_v42 = vunpack.i.l.bf16 %v600_v30 }
  0x28   : > { %v602_v43 = vunpack.i.h.bf16 %v600_v30  ;;  %v618_v46 = vrot.slane %v617_v36, 4  ;;  %v629_v47 = vunpack.i.l.bf16 %v628_v37  ;;  %v630_v48 = vunpack.i.h.bf16 %v628_v37 }
  0x29   : > { %v1583_v49 = vcombine.low %v1915_v33, %v1915_v33  ;;  %v645_v50 = vmax.f32 %v643_v40, %v644_v41  ;;  %v1584_v53 = vcombine.high %v1915_v33, %v1915_v33  ;;  %v667_v54 = vmax.bf16 %v1552_v35, %v1536_v28 }
  0x2a   : > { %v603_v51 = vmax.f32 %v601_v42, %v602_v43  ;;  %v619_v57 = vmax.f32 %v617_v36, %v618_v46  ;;  %v631_v58 = vmax.f32 %v629_v47, %v630_v48  ;;  %v1537_v63 = vcombine.low %v1926_v44, %v1929_v45 }
  0x2b   : > { %v1538_v0 = vcombine.high %v1926_v44, %v1929_v45  ;;  %v646_v1 = vrot.slane %v645_v50, 4  ;;  %v668_v3 = vmax.bf16 %v1568_v39, %v667_v54  ;;  %v669_v4 = vsel %vm1841_vm2, %v1584_v53, 4286644096 }
  0x2c   : > { %v604_v2 = vrot.slane %v603_v51, 4  ;;  %v620_v7 = vrot.slane %v619_v57, 2  ;;  %v632_v12 = vrot.slane %v631_v58, 4  ;;  %v1553_v17 = vcombine.low %v261_v55, %v269_v56 }
  0x2d   : > { %v1554_v19 = vcombine.high %v261_v55, %v269_v56  ;;  %v647_v23 = vmax.f32 %v645_v50, %v646_v1  ;;  %v670_v27 = vmax.bf16 %v669_v4, %v668_v3  ;;  %v1569_v28 = vcombine.low %v1938_v59, %v285_v60 }
  0x2e   : > { %v605_v26 = vmax.f32 %v603_v51, %v604_v2  ;;  %v621_v29 = vmax.f32 %v619_v57, %v620_v7  ;;  %v633_v30 = vmax.f32 %v631_v58, %v632_v12  ;;  %v1570_v33 = vcombine.high %v1938_v59, %v285_v60 }
  0x2f   : > { %v1585_v35 = vcombine.low %v293_v5, %v293_v5  ;;  %v648_v36 = vrot.slane %v647_v23, 2  ;;  %v671_v39 = vunpack.i.l.bf16 %v670_v27  ;;  %v672_v40 = vunpack.i.h.bf16 %v670_v27 }
  0x30   : > { %v606_v37 = vrot.slane %v605_v26, 2  ;;  %v622_v41 = vrot.slane %v621_v29, 1  ;;  %v634_v42 = vrot.slane %v633_v30, 2  ;;  %v1586_v43 = vcombine.high %v293_v5, %v293_v5 }
  0x31   : > { %v695_v44 = vmax.bf16 %v1554_v19, %v1538_v0  ;;  %v649_v45 = vmax.f32 %v647_v23, %v648_v36  ;;  %v673_v47 = vmax.f32 %v671_v39, %v672_v40  ;;  %v880_v48 = vcombine.high %v1866_v31, %v1866_v31  ;;  %v1969_v19 = vld [vmem:[%s1839_s25 + $0x60] sm:$0xff] }
  0x32   : > { %v607_v46 = vmax.f32 %v605_v26, %v606_v37  ;;  %v623_v50 = vmax.f32 %v621_v29, %v622_v41  ;;  %v635_v51 = vmax.f32 %v633_v30, %v634_v42  ;;  %v697_v54 = vsel %vm1841_vm2, %v1586_v43, 4286644096  ;;  %v1974_v26 = vld [vmem:[%s1839_s25 + $0xa0] sm:$0xff] }
  0x33   : > { %v696_v53 = vmax.bf16 %v1570_v33, %v695_v44  ;;  %v650_v55 = vrot.slane %v649_v45, 1  ;;  %v674_v57 = vrot.slane %v673_v47, 4  ;;  %v653_v58 = vmax.bf16 %v1551_v34, %v1535_v22  ;;  %v1982_v33 = vld [vmem:[%s1839_s25 + $0x120] sm:$0xff] }
  0x34   : > { %v608_v56 = vrot.slane %v607_v46, 1  ;;  %v624_v59 = vpack.i.bf16 %v623_v50, %v623_v50  ;;  %v636_v60 = vrot.slane %v635_v51, 1  ;;  %v655_v1 = vsel %vm1841_vm2, %v1583_v49, 4286644096  ;;  %v1966_v49 = vld [vmem:[%s1839_s25 + $0x20] sm:$0xff]  ;;  %v255_v50 = vld [vmem:[%s1839_s25 + $0x68] sm:$0xff] }
  0x35   : > { %v698_v0 = vmax.bf16 %v697_v54, %v696_v53  ;;  %v651_v2 = vmax.f32 %v649_v45, %v650_v55  ;;  %v675_v4 = vmax.f32 %v673_v47, %v674_v57  ;;  %v654_v5 = vmax.bf16 %v1567_v38, %v653_v58  ;;  %v1985_v36 = vld [vmem:[%s1839_s25 + $0x160] sm:$0xff]  ;;  %v247_v47 = vld [vmem:[%s1839_s25 + $0x28] sm:$0xff] }
  0x36   : > { %v609_v3 = vmax.f32 %v607_v46, %v608_v56  ;;  %947 = vmatprep.mubr.bf16.mxu0 %v624_v59  ;;  %v637_v61 = vmax.f32 %v635_v51, %v636_v60  ;;  %v681_v9 = vmax.bf16 %v1553_v17, %v1537_v63  ;;  %v683_v38 = vsel %vm1841_vm2, %v1585_v35, 4286644096  ;;  %v1977_v63 = vld [vmem:[%s1839_s25 + $0xe0] sm:$0xff]  ;;  %v263_v55 = vld [vmem:[%s1839_s25 + $0xa8] sm:$0xff] }
  0x37   : > { %v699_v62 = vunpack.i.l.bf16 %v698_v0  ;;  %v700_v8 = vunpack.i.h.bf16 %v698_v0  ;;  %v652_v22 = vpack.i.bf16 %v651_v2, %v651_v2  ;;  %v676_v7 = vrot.slane %v675_v4, 2  ;;  %v1989_v37 = vld [vmem:[%s1839_s25 + $0x1a0] sm:$0x11]  ;;  %v271_v60 = vld [vmem:[%s1839_s25 + $0xe8] sm:$0xff] }
  0x38   : > { %v610_v34 = vpack.i.bf16 %v609_v3, %v609_v3  ;;  %v656_v12 = vmax.bf16 %v655_v1, %v654_v5  ;;  %v638_v23 = vpack.i.bf16 %v637_v61, %v637_v61  ;;  %v682_v21 = vmax.bf16 %v1569_v28, %v681_v9  ;;  %v279_v0 = vld [vmem:[%s1839_s25 + $0x128] sm:$0xff] }
  0x39   : > { %v701_v20 = vmax.f32 %v699_v62, %v700_v8  ;;  %987 = vmatprep.mubr.bf16.mxu1 %v652_v22  ;;  %v677_v17 = vmax.f32 %v675_v4, %v676_v7  ;;  %v881_v30 = vcombine.high %v1869_v32, %v1869_v32  ;;  %v1539_v39 = vcombine.low %v1966_v49, %v1969_v19  ;;  %v287_v1 = vld [vmem:[%s1839_s25 + $0x168] sm:$0xff] }
  0x3a   : > { %948 = vmatmul.mubr.bf16.vlgmr.msra.gmra.mxu0 %v610_v34  ;;  %v657_v27 = vunpack.i.l.bf16 %v656_v12  ;;  %v658_v29 = vunpack.i.h.bf16 %v656_v12  ;;  %988 = vmatmul.mubr.bf16.vlgmr.msra.gmra.mxu1 %v638_v23  ;;  %v684_v35 = vmax.bf16 %v683_v38, %v682_v21  ;;  %v1540_v40 = vcombine.high %v1966_v49, %v1969_v19  ;;  %v295_v22 = vld [vmem:[%s1839_s25 + $0x1a8] sm:$0x11] }
  0x3b   : > { %1010 = vmatpush1.bf16.xpose.msra.mxu0 %v1857_v24  ;;  %v702_v28 = vrot.slane %v701_v20, 4  ;;  %1050 = vmatpush1.bf16.xpose.msra.mxu1 %v1860_v25  ;;  %v678_v41 = vrot.slane %v677_v17, 1  ;;  %v1555_v24 = vcombine.low %v1974_v26, %v1977_v63  ;;  %v1556_v43 = vcombine.high %v1974_v26, %v1977_v63 }
  0x3c   : > { %1089 = vmatprep.subr.bf16.mxu0 %v880_v48  ;;  %v659_v42 = vmax.f32 %v657_v27, %v658_v29  ;;  %v685_v45 = vunpack.i.l.bf16 %v684_v35  ;;  %v686_v46 = vunpack.i.h.bf16 %v684_v35  ;;  %1129 = vmatprep.subr.bf16.mxu1 %v881_v30  ;;  %v1571_v25 = vcombine.low %v1982_v33, %v1985_v36 }
  0x3d   : > { %v703_v44 = vmax.f32 %v701_v20, %v702_v28  ;;  %v679_v48 = vmax.f32 %v677_v17, %v678_v41  ;;  %v1572_v53 = vcombine.high %v1982_v33, %v1985_v36  ;;  %v1587_v54 = vcombine.low %v1989_v37, %v1989_v37 }
  0x3e   : > { %v660_v51 = vrot.slane %v659_v42, 4  ;;  %v687_v57 = vmax.f32 %v685_v45, %v686_v46  ;;  %v1588_v58 = vcombine.high %v1989_v37, %v1989_v37  ;;  %v723_v59 = vmax.bf16 %v1556_v43, %v1540_v40 }
  0x3f   : > { %v704_v56 = vrot.slane %v703_v44, 2  ;;  %v680_v2 = vpack.i.bf16 %v679_v48, %v679_v48  ;;  %v1541_v4 = vcombine.low %v247_v47, %v255_v50  ;;  %v1542_v5 = vcombine.high %v247_v47, %v255_v50 }
  0x40   : > { %v661_v3 = vmax.f32 %v659_v42, %v660_v51  ;;  %v688_v62 = vrot.slane %v687_v57, 4  ;;  %v724_v8 = vmax.bf16 %v1572_v53, %v723_v59  ;;  %v725_v9 = vsel %vm1841_vm2, %v1588_v58, 4286644096 }
  0x41   : > { %v705_v61 = vmax.f32 %v703_v44, %v704_v56  ;;  %1027 = vmatprep.mubr.bf16.mxu0 %v680_v2  ;;  %v1557_v7 = vcombine.low %v263_v55, %v271_v60  ;;  %v1558_v12 = vcombine.high %v263_v55, %v271_v60  ;;  %v1573_v49 = vcombine.low %v279_v0, %v287_v1  ;;  %v2028_v55 = vld [vmem:[%s1839_s25 + $0x30] sm:$0xff] }
  0x42   : > { %v662_v34 = vrot.slane %v661_v3, 2  ;;  %v689_v23 = vmax.f32 %v687_v57, %v688_v62  ;;  %v726_v20 = vmax.bf16 %v725_v9, %v724_v8  ;;  %v1574_v21 = vcombine.high %v279_v0, %v287_v1  ;;  %v2036_v1 = vld [vmem:[%s1839_s25 + $0xb0] sm:$0xff] }
  0x43   : > { %v706_v19 = vrot.slane %v705_v61, 1  ;;  %v1589_v26 = vcombine.low %v295_v22, %v295_v22  ;;  %v1590_v63 = vcombine.high %v295_v22, %v295_v22  ;;  %v751_v17 = vmax.bf16 %v1558_v12, %v1542_v5  ;;  %v2051_v5 = vld [vmem:[%s1839_s25 + $0x170] sm:$0xff] }
  0x44   : > { %v663_v38 = vmax.f32 %v661_v3, %v662_v34  ;;  %v690_v29 = vrot.slane %v689_v23, 2  ;;  %v727_v30 = vunpack.i.l.bf16 %v726_v20  ;;  %v728_v33 = vunpack.i.h.bf16 %v726_v20  ;;  %v2061_v12 = vld [vmem:[%s1839_s25 + $0x1b0] sm:$0x11] }
  0x45   : > { %v707_v27 = vmax.f32 %v705_v61, %v706_v19  ;;  %v752_v28 = vmax.bf16 %v1574_v21, %v751_v17  ;;  %v753_v35 = vsel %vm1841_vm2, %v1590_v63, 4286644096  ;;  %v2021_v37 = vrot.slane %v1825_v10, %v1834_v13  ;;  %v2070_v21 = vld [vmem:[%s1839_s25 + $0x38] sm:$0xff] }
  0x46   : > { %v664_v36 = vrot.slane %v663_v38, 1  ;;  %v691_v41 = vmax.f32 %v689_v23, %v690_v29  ;;  %v729_v42 = vmax.f32 %v727_v30, %v728_v33  ;;  %v709_v43 = vmax.bf16 %v1555_v24, %v1539_v39  ;;  %v2031_v39 = vld [vmem:[%s1839_s25 + $0x70] sm:$0xff] }
  0x47   : > { %v708_v40 = vpack.i.bf16 %v707_v27, %v707_v27  ;;  %v754_v45 = vmax.bf16 %v753_v35, %v752_v28  ;;  %v897_v46 = vcombine.high %v2021_v37, %v2021_v37  ;;  %v711_v47 = vsel %vm1841_vm2, %v1587_v54, 4286644096  ;;  %v265_v28 = vld [vmem:[%s1839_s25 + $0xb8] sm:$0xff] }
  0x48   : > { %v665_v44 = vmax.f32 %v663_v38, %v664_v36  ;;  %v692_v50 = vrot.slane %v691_v41, 1  ;;  %v730_v48 = vrot.slane %v729_v42, 4  ;;  %v710_v51 = vmax.bf16 %v1571_v25, %v709_v43  ;;  %v2039_v25 = vld [vmem:[%s1839_s25 + $0xf0] sm:$0xff]  ;;  %v257_v38 = vld [vmem:[%s1839_s25 + $0x78] sm:$0xff] }
  0x49   : > { %1067 = vmatprep.mubr.bf16.mxu1 %v708_v40  ;;  %v737_v53 = vmax.bf16 %v1557_v7, %v1541_v4  ;;  %v755_v56 = vunpack.i.l.bf16 %v754_v45  ;;  %v756_v57 = vunpack.i.h.bf16 %v754_v45  ;;  %v739_v58 = vsel %vm1841_vm2, %v1589_v26, 4286644096  ;;  %v2048_v4 = vld [vmem:[%s1839_s25 + $0x130] sm:$0xff]  ;;  %v273_v35 = vld [vmem:[%s1839_s25 + $0xf8] sm:$0xff] }
  0x4a   : > { %v666_v24 = vpack.i.bf16 %v665_v44, %v665_v44  ;;  %v693_v54 = vmax.f32 %v691_v41, %v692_v50  ;;  %v731_v59 = vmax.f32 %v729_v42, %v730_v48  ;;  %v712_v60 = vmax.bf16 %v711_v47, %v710_v51  ;;  %v281_v42 = vld [vmem:[%s1839_s25 + $0x138] sm:$0xff] }
  0x4b   : > { %v738_v0 = vmax.bf16 %v1573_v49, %v737_v53  ;;  %v757_v2 = vmax.f32 %v755_v56, %v756_v57  ;;  %v2045_v3 = vrot.slane %v882_v15, %v1834_v13  ;;  %v1543_v61 = vcombine.low %v2028_v55, %v2031_v39  ;;  %v289_v43 = vld [vmem:[%s1839_s25 + $0x178] sm:$0xff] }
  0x4c   : > { %1028 = vmatmul.mubr.bf16.vlgmr.msra.gmra.mxu0 %v666_v24  ;;  %v1544_v62 = vcombine.high %v2028_v55, %v2031_v39  ;;  %v694_v8 = vpack.i.bf16 %v693_v54, %v693_v54  ;;  %v732_v9 = vrot.slane %v731_v59, 2  ;;  %v713_v22 = vunpack.i.l.bf16 %v712_v60  ;;  %v297_v24 = vld [vmem:[%s1839_s25 + $0x1b8] sm:$0x11]  ;;  %s1664_s25 = scalar_lea.vmem %s2131_s15, 16 }
  0x4d   : > { %1090 = vmatpush1.bf16.xpose.msra.mxu0 %v1866_v31  ;;  %v714_v10 = vunpack.i.h.bf16 %v712_v60  ;;  %v758_v15 = vrot.slane %v757_v2, 4  ;;  %v740_v34 = vmax.bf16 %v739_v58, %v738_v0  ;;  %v898_v7 = vcombine.high %v2045_v3, %v2045_v3  ;;  %p1665_p11 = scmp.ne.s32.totalorder %s2131_s15, %s1664_s25  ;;  %p1672_p1 = scmp.lt.s32.totalorder %s1670_s6, %s1664_s25 }
  0x4e   : > { %1169 = vmatprep.subr.bf16.mxu0 %v897_v46  ;;  %v1559_v49 = vcombine.low %v2036_v1, %v2039_v25  ;;  %1068 = vmatmul.mubr.bf16.vlgmr.msra.gmra.mxu1 %v694_v8  ;;  %v733_v19 = vmax.f32 %v731_v59, %v732_v9  ;;  %v1560_v31 = vcombine.high %v2036_v1, %v2039_v25 }
  0x4f   : > { %v715_v23 = vmax.f32 %v713_v22, %v714_v10  ;;  %v1575_v20 = vcombine.low %v2048_v4, %v2051_v5  ;;  %1130 = vmatpush1.bf16.xpose.msra.mxu1 %v1869_v32  ;;  %v759_v26 = vmax.f32 %v757_v2, %v758_v15  ;;  %v741_v63 = vunpack.i.l.bf16 %v740_v34  ;;  %p1666_p12 = pnand %p1665_p11, %p1797_p5  ;;  %p1673_p2 = por %p1672_p1, %p1671_p0 }
  0x50   : > { %v742_v17 = vunpack.i.h.bf16 %v740_v34  ;;  %v1576_v27 = vcombine.high %v2048_v4, %v2051_v5  ;;  %v734_v29 = vrot.slane %v733_v19, 1  ;;  %1209 = vmatprep.subr.bf16.mxu1 %v898_v7  ;;  %v1591_v33 = vcombine.low %v2061_v12, %v2061_v12 }
  0x51   : > { %v716_v30 = vrot.slane %v715_v23, 4  ;;  %v1592_v36 = vcombine.high %v2061_v12, %v2061_v12  ;;  %v760_v32 = vrot.slane %v759_v26, 2  ;;  %v779_v41 = vmax.bf16 %v1560_v31, %v1544_v62  ;;  %p1667_p13 = pneg %p1666_p12 }
  0x52   : > { %v743_v40 = vmax.f32 %v741_v63, %v742_v17  ;;  %v1545_v44 = vcombine.low %v2070_v21, %v257_v38  ;;  %v735_v45 = vmax.f32 %v733_v19, %v734_v29  ;;  %v1546_v50 = vcombine.high %v2070_v21, %v257_v38 }
  0x53   : > { %v717_v46 = vmax.f32 %v715_v23, %v716_v30  ;;  %v781_v47 = vsel %vm1841_vm2, %v1592_v36, 4286644096  ;;  %v761_v48 = vmax.f32 %v759_v26, %v760_v32  ;;  %v780_v53 = vmax.bf16 %v1576_v27, %v779_v41  ;;  %p1674_p3 = pnand %p1673_p2, %p1667_p13 }
  0x54   : > { %v744_v51 = vrot.slane %v743_v40, 4  ;;  %v1561_v56 = vcombine.low %v265_v28, %v273_v35  ;;  %v736_v57 = vpack.i.bf16 %v735_v45, %v735_v45  ;;  %v1562_v54 = vcombine.high %v265_v28, %v273_v35 }
  0x55   : > { %v718_v58 = vrot.slane %v717_v46, 2  ;;  %v1577_v59 = vcombine.low %v281_v42, %v289_v43  ;;  %v762_v60 = vrot.slane %v761_v48, 1  ;;  %v782_v1 = vmax.bf16 %v781_v47, %v780_v53 }
  0x56   : > { %v745_v0 = vmax.f32 %v743_v40, %v744_v51  ;;  %v1578_v25 = vcombine.high %v281_v42, %v289_v43  ;;  %1107 = vmatprep.mubr.bf16.mxu0 %v736_v57  ;;  %v1593_v4 = vcombine.low %v297_v24, %v297_v24  ;;  %v1594_v5 = vcombine.high %v297_v24, %v297_v24 }
  0x57   : > { %v719_v2 = vmax.f32 %v717_v46, %v718_v58  ;;  %v807_v62 = vmax.bf16 %v1562_v54, %v1546_v50  ;;  %v763_v8 = vmax.f32 %v761_v48, %v762_v60  ;;  %v783_v22 = vunpack.i.l.bf16 %v782_v1  ;;  %v241_v48 = vld [vmem:[%s233_s7] sm:$0x3f] }
  0x58   : > { %v746_v9 = vrot.slane %v745_v0, 2  ;;  %v784_v10 = vunpack.i.h.bf16 %v782_v1  ;;  %v809_v7 = vsel %vm1841_vm2, %v1594_v5, 4286644096  ;;  %v2093_v12 = vrot.slane %v1830_v11, %v1834_v13 }
  0x59   : > { %v720_v15 = vrot.slane %v719_v2, 1  ;;  %v808_v34 = vmax.bf16 %v1578_v25, %v807_v62  ;;  %v764_v19 = vpack.i.bf16 %v763_v8, %v763_v8  ;;  %v765_v21 = vmax.bf16 %v1559_v49, %v1543_v61 }
  0x5a   : > { %v747_v23 = vmax.f32 %v745_v0, %v746_v9  ;;  %v785_v31 = vmax.f32 %v783_v22, %v784_v10  ;;  %v1306_v63 = vcombine.high %v2093_v12, %v2093_v12  ;;  %v767_v17 = vsel %vm1841_vm2, %v1591_v33, 4286644096  ;;  %v1595_v9 = vld.sshfl [vmem:[%s2172_s2 + $0x8] sm:$0x33 pattern:$0x76325410] }
  0x5b   : > { %v721_v38 = vmax.f32 %v719_v2, %v720_v15  ;;  %v810_v26 = vmax.bf16 %v809_v7, %v808_v34  ;;  %1147 = vmatprep.mubr.bf16.mxu1 %v764_v19  ;;  %v766_v30 = vmax.bf16 %v1575_v20, %v765_v21  ;;  %v793_v36 = vmax.bf16 %v1561_v56, %v1545_v44 }
  0x5c   : > { %v748_v27 = vrot.slane %v747_v23, 1  ;;  %v786_v29 = vrot.slane %v785_v31, 4  ;;  %v795_v55 = vsel %vm1841_vm2, %v1593_v4, 4286644096  ;;  %v1305_v33 = vrot.slane %v1291_v16, %v1834_v13 }
  0x5d   : > { %v722_v28 = vpack.i.bf16 %v721_v38, %v721_v38  ;;  %v811_v35 = vunpack.i.l.bf16 %v810_v26  ;;  %v812_v32 = vunpack.i.h.bf16 %v810_v26  ;;  %v768_v49 = vmax.bf16 %v767_v17, %v766_v30 }
  0x5e   : > { %v749_v39 = vmax.f32 %v747_v23, %v748_v27  ;;  %v787_v61 = vmax.f32 %v785_v31, %v786_v29  ;;  %v794_v40 = vmax.bf16 %v1577_v59, %v793_v36  ;;  %v1307_v46 = vcombine.high %v1305_v33, %v1305_v33 }
  0x5f   : > { %1108 = vmatmul.mubr.bf16.vlgmr.msra.gmra.mxu0 %v722_v28  ;;  %v813_v41 = vmax.f32 %v811_v35, %v812_v32  ;;  %v769_v43 = vunpack.i.l.bf16 %v768_v49  ;;  %v770_v44 = vunpack.i.h.bf16 %v768_v49  ;;  %v1242_v11 = vsub.s32 %v1239_v52, %v1817_v6 }
  0x60   : > { %v750_v20 = vpack.i.bf16 %v749_v39, %v749_v39  ;;  %1170 = vmatpush1.bf16.xpose.msra.mxu0 %v2021_v37  ;;  %v788_v42 = vrot.slane %v787_v61, 2  ;;  %v796_v45 = vmax.bf16 %v795_v55, %v794_v40  ;;  %v1236_v4 = vcombine.high %v241_v48, %v241_v48 }
  0x61   : > { %v814_v14 = vrot.slane %v813_v41, 4  ;;  %1336 = vmatprep.subr.bf16.mxu0 %v1306_v63  ;;  %v771_v50 = vmax.f32 %v769_v43, %v770_v44  ;;  %v1243_v54 = vrot.slane %v241_v48, %v1242_v11  ;;  %v1315_v19 = vcombine.high %v1595_v9, %v1595_v9 }
  0x62   : > { %1148 = vmatmul.mubr.bf16.vlgmr.msra.gmra.mxu1 %v750_v20  ;;  %v789_v47 = vmax.f32 %v787_v61, %v788_v42  ;;  %v797_v16 = vunpack.i.l.bf16 %v796_v45  ;;  %v798_v37 = vunpack.i.h.bf16 %v796_v45  ;;  %v1250_v34 = vrot.slane %v1236_v4, %v1242_v11 }
  0x63   : > { %1210 = vmatpush1.bf16.xpose.msra.mxu1 %v2045_v3  ;;  %v815_v13 = vmax.f32 %v813_v41, %v814_v14  ;;  %v772_v53 = vrot.slane %v771_v50, 4  ;;  %v1251_v3 = vcombine.high %v1243_v54, %v1243_v54  ;;  %v1259_v26 = vrot.slane %v1243_v54, %v1242_v11 }
  0x64   : > { %v790_v51 = vrot.slane %v789_v47, 1  ;;  %1376 = vmatprep.subr.bf16.mxu1 %v1307_v46  ;;  %v799_v56 = vmax.f32 %v797_v16, %v798_v37  ;;  %v1252_v38 = vcombine.high %v1250_v34, %v1250_v34  ;;  %v1266_v27 = vrot.slane %v1250_v34, %v1242_v11 }
  0x65   : > { %v816_v24 = vrot.slane %v815_v13, 2  ;;  %v773_v58 = vmax.f32 %v771_v50, %v772_v53  ;;  %v1273_v10 = vrot.slane %v1251_v3, %v1242_v11  ;;  %v1281_v17 = vcombine.high %v1259_v26, %v1259_v26 }
  0x66   : > { %v791_v57 = vmax.f32 %v789_v47, %v790_v51  ;;  %v800_v60 = vrot.slane %v799_v56, 4  ;;  %v1280_v63 = vrot.slane %v1252_v38, %v1242_v11 }
  0x67   : > { %v817_v59 = vmax.f32 %v815_v13, %v816_v24  ;;  %v774_v1 = vrot.slane %v773_v58, 2  ;;  %v1282_v31 = vcombine.high %v1273_v10, %v1273_v10 }
  0x68   : > { %v792_v0 = vpack.i.bf16 %v791_v57, %v791_v57  ;;  %v801_v6 = vmax.f32 %v799_v56, %v800_v60 }
  0x69   : > { %v818_v18 = vrot.slane %v817_v59, 1  ;;  %v775_v52 = vmax.f32 %v773_v58, %v774_v1 }
  0x6a   : > { %1187 = vmatprep.mubr.bf16.mxu0 %v792_v0  ;;  %v802_v2 = vrot.slane %v801_v6, 2 }
  0x6b   : > { %v819_v25 = vmax.f32 %v817_v59, %v818_v18  ;;  %v776_v5 = vrot.slane %v775_v52, 1 }
  0x6c   : > { %v803_v8 = vmax.f32 %v801_v6, %v802_v2 }
  0x6d   : > { %v820_v62 = vpack.i.bf16 %v819_v25, %v819_v25  ;;  %v777_v22 = vmax.f32 %v775_v52, %v776_v5 }
  0x6e   : > { %v804_v15 = vrot.slane %v803_v8, 1 }
  0x6f   : > { %1227 = vmatprep.mubr.bf16.mxu1 %v820_v62  ;;  %v778_v7 = vpack.i.bf16 %v777_v22, %v777_v22 }
  0x70   : > { %v805_v23 = vmax.f32 %v803_v8, %v804_v15 }
  0x71   : > { %1188 = vmatmul.mubr.bf16.vlgmr.msra.gmra.mxu0 %v778_v7 }
  0x72   : > { %v806_v21 = vpack.i.bf16 %v805_v23, %v805_v23  ;;  %1337 = vmatpush1.bf16.xpose.msra.mxu0 %v2093_v12  ;;  %1354 = vmatprep.mubr.bf16.mxu0 %v1273_v10 }
  0x73   : > { %1416 = vmatprep.subr.bf16.mxu0 %v1315_v19 }
  0x74   : > { %1228 = vmatmul.mubr.bf16.vlgmr.msra.gmra.mxu1 %v806_v21 }
  0x75   : > { %1377 = vmatpush1.bf16.xpose.msra.mxu1 %v1305_v33  ;;  %1394 = vmatprep.mubr.bf16.mxu1 %v1282_v31 }
  0x79   : > { %1355 = vmatmul.mubr.bf16.vlgmr.msra.gmra.mxu0 %v1259_v26 }
  0x7a   : > { %1417 = vmatpush1.bf16.xpose.msra.mxu0 %v1595_v9  ;;  %1434 = vmatprep.mubr.bf16.mxu0 %v1280_v63  ;;  %v1442_v9 = vld [vmem:[%s2174_s4] sm:$0x1] }
  0x7c   : > { %1395 = vmatmul.mubr.bf16.vlgmr.msra.gmra.mxu1 %v1281_v17 }
  0x81   : > { %1435 = vmatmul.mubr.bf16.vlgmr.msra.gmra.mxu0 %v1266_v27 }
  0xfa   : > { %v949_v29 = vpop.f32.mrf.mxu0  ;;  %v989_v30 = vpop.f32.mrf.mxu1 }
  0xfb   : > { %v990_v13 = vadd.f32 %v989_v30, %v949_v29 }
  0xfc   : > { %v951_v36 = vpop.f32.mrf.mxu0  ;;  %v991_v28 = vpop.f32.mrf.mxu1 }
  0xfe   : > { %v952_v12 = vpop.f32.mrf.mxu0  ;;  %v992_v35 = vpop.f32.mrf.mxu1 }
 0x100   : > { %v953_v32 = vpop.f32.mrf.mxu0  ;;  %v993_v55 = vpop.f32.mrf.mxu1 }
 0x10c   : > { %v1029_v39 = vpop.f32.mrf.mxu0 }
 0x10d   : > { %v1030_v16 = vadd.f32 %v1029_v39, %v990_v13 }
 0x10e   : > { %v1031_v61 = vpop.f32.mrf.mxu0  ;;  %v1069_v49 = vpop.f32.mrf.mxu1 }
 0x10f   : > { %v1070_v37 = vadd.f32 %v1069_v49, %v1030_v16 }
 0x110   : > { %v1032_v40 = vpop.f32.mrf.mxu0  ;;  %v1071_v41 = vpop.f32.mrf.mxu1 }
 0x112   : > { %v1033_v33 = vpop.f32.mrf.mxu0  ;;  %v1072_v20 = vpop.f32.mrf.mxu1 }
 0x114   : > { %v1073_v42 = vpop.f32.mrf.mxu1 }
 0x11f   : > { %v1109_v43 = vpop.f32.mrf.mxu0 }
 0x120   : > { %v1110_v48 = vadd.f32 %v1109_v43, %v1070_v37 }
 0x121   : > { %v1111_v44 = vpop.f32.mrf.mxu0 }
 0x122   : > { %v1149_v14 = vpop.f32.mrf.mxu1 }
 0x123   : > { %v1112_v45 = vpop.f32.mrf.mxu0  ;;  %v1150_v24 = vadd.f32 %v1149_v14, %v1110_v48 }
 0x124   : > { %v1151_v46 = vpop.f32.mrf.mxu1 }
 0x125   : > { %v1113_v47 = vpop.f32.mrf.mxu0 }
 0x126   : > { %v1152_v50 = vpop.f32.mrf.mxu1 }
 0x128   : > { %v1153_v11 = vpop.f32.mrf.mxu1 }
 0x131   : > { %v1189_v51 = vpop.f32.mrf.mxu0 }
 0x132   : > { %v1190_v58 = vadd.f32 %v1189_v51, %v1150_v24 }
 0x133   : > { %v1191_v53 = vpop.f32.mrf.mxu0 }
 0x134   : > { %v1229_v56 = vpop.f32.mrf.mxu1 }
 0x135   : > { %v1192_v57 = vpop.f32.mrf.mxu0  ;;  %v1230_v1 = vadd.f32 %v1229_v56, %v1190_v58 }
 0x136   : > { %v1231_v54 = vpop.f32.mrf.mxu1 }
 0x137   : > { %v1193_v59 = vpop.f32.mrf.mxu0 }
 0x138   : > { %v1232_v60 = vpop.f32.mrf.mxu1 }
 0x139   : > { %v1356_v0 = vpop.f32.mrf.mxu0 }
 0x13a   : > { %v1233_v18 = vpop.f32.mrf.mxu1  ;;  %v1357_v52 = vadd.f32 %v1356_v0, %v1230_v1 }
 0x13b   : > { %v1358_v6 = vpop.f32.mrf.mxu0 }
 0x13c   : > { %v1396_v3 = vpop.f32.mrf.mxu1 }
 0x13d   : > { %v1359_v25 = vpop.f32.mrf.mxu0  ;;  %v1397_v5 = vadd.f32 %v1396_v3, %v1357_v52 }
 0x13e   : > { %v1398_v2 = vpop.f32.mrf.mxu1 }
 0x13f   : > { %v1360_v4 = vpop.f32.mrf.mxu0 }
 0x140   : > { %v1399_v62 = vpop.f32.mrf.mxu1 }
 0x141   : > { %v1436_v8 = vpop.f32.mrf.mxu0 }
 0x142   : > { %v1400_v22 = vpop.f32.mrf.mxu1  ;;  %v1437_v10 = vadd.f32 %v1436_v8, %v1397_v5 }
 0x143   : > { %v1438_v15 = vpop.f32.mrf.mxu0 }
 0x144   : > { %v1443_v34 = vadd.f32 %v1442_v9, %v1437_v10 }
 0x145   : > { %v1439_v7 = vpop.f32.mrf.mxu0 }
 0x146   : > { %1445 = vst.msk [vmem:[%s229_s14] sm:$0x1] %vm1444_vm3, %v1443_v34 }
 0x147   : > { %v1440_v19 = vpop.f32.mrf.mxu0 }
 0x148   : > { %1677 = shalt.err (!%p1674_p3)
}
 0x149   : > { %s1678_s7 = scalar_lea.hbm %s2129_s23, 16  ;;  %s1682_s10 = scalar_lea.hbm %s2175_s5, 32 }
 0x14a   : > { %p1679_p4 = scmp.ne.s32.totalorder %s2129_s23, %s1678_s7  ;;  %p1683_p9 = scmp.lt.s32.totalorder %s2129_s23, %s2175_s5 }
 0x14b   : > { %p1684_p10 = scmp.lt.s32.totalorder %s1682_s10, %s1678_s7 }
 0x14c   : > { %p1680_p7 = pnand %p1679_p4, %p1797_p5 }
 0x14d   : > { %p1685_p11 = por %p1684_p10, %p1683_p9 }
 0x14e   : > { %p1681_p8 = pneg %p1680_p7 }
 0x150   : > { %p1686_p12 = pnand %p1685_p11, %p1681_p8 }
 0x152   : > { %1689 = shalt.err (!%p1686_p12)
}
 0x153   : > { %1601 = dma.vmem_to_hbm [thread:$0]  (%p1797_p5), %s2131_s15, 16, %s2129_s23, %s1447_s22  }
 0x154 PF: > { %p1607_p13 = scmp.ge.s32.totalorder %s1724_s21, 2  ;;  %s1471_s13 = sand.u32 1, %s1712_s18  }
 0x155   : > { %s1472_s14 = scalar_lea.sflag [#allocation3], %s1471_s13 }
 0x156   : > { %p1604_p0 = pnand %p1607_p13, %p1801_p6 }
 0x158   : > { %p1605_p1 = pneg %p1604_p0 }
 0x15a   : > { %1707 = dma.done.wait (%p1605_p1), %s1472_s14, 16  }
 0x15b   : > { %1709 = vsyncadd (%p1605_p1), %s1472_s14, 4294967280  ;;  %p15_p2 = scmp.ge.s32.totalorder %s1784_s24, 4   ;;  %s2180_s18 = smov %s1716_s19 }
 0x15c   : > { %s2181_s19 = smov %s1720_s20  ;;  %s2182_s20 = smov %s1795_s27 }
 0x15d   : > { %s2183_s21 = smov %s1784_s24  ;;  %17 = sbr.rel (!%p15_p2) target bundleno = 3 (0x3), region = 78 }
 0x162   :  { %1476 = vsyncpa [#allocation3], 1 }
 0x163   :  { %1478 = vsyncpa [#allocation3 + $0x1], 1 }

</bundles_post_ra>
